<compile_context>
chip_gen: v5e
topology: v5e:2x2
jax: 0.10.0
libtpu: 0.0.40
codegen_flags: <defaults>
</compile_context>

<pallas_src>
import functools

import jax
import jax.numpy as jnp
from jax.experimental import pallas as pl
from jax.experimental.pallas import tpu as pltpu


def _round_up(n, m):
    return ((n + m - 1) // m) * m


def actor_critic_kernel(x_ref, w1_ref, b1_ref, w2_ref, b2_ref, wh_ref, bh_ref,
                        out_ref, *, action_dim):
    """fc1 -> relu -> fc2 -> relu -> fused (actor||critic) head -> lane-dense slab.

    out_ref is [B, HEAD_PAD]:
      lanes [0, action_dim)        -> softmax action probabilities
      lane  action_dim             -> critic state value
      lanes (action_dim, HEAD_PAD) -> zeros (padding, sliced off in the wrapper)
    """
    x = x_ref[...]

    # fc1 + relu
    h1 = jnp.dot(x, w1_ref[...], preferred_element_type=jnp.float32) + b1_ref[...]
    h1 = jnp.maximum(h1, 0.0)

    # fc2 + relu
    h2 = jnp.dot(h1, w2_ref[...], preferred_element_type=jnp.float32) + b2_ref[...]
    h2 = jnp.maximum(h2, 0.0)

    # fused actor+critic head: single MXU matmul, lane-dense [B, HEAD_PAD] result
    head = jnp.dot(h2, wh_ref[...], preferred_element_type=jnp.float32) + bh_ref[...]

    lane = jax.lax.broadcasted_iota(jnp.int32, head.shape, dimension=1)
    is_action = lane < action_dim

    # numerically-stable softmax restricted to the real action lanes
    logits = jnp.where(is_action, head, -jnp.inf)
    m = jnp.max(logits, axis=-1, keepdims=True)
    e = jnp.exp(logits - m)                              # padded lanes -> exp(-inf) = 0
    denom = jnp.sum(e, axis=-1, keepdims=True)
    probs = e * pl.reciprocal(denom, approx=False)       # EUP reciprocal, frees VALU slot

    # lane `action_dim` carries the raw critic value (wc column of the fused head);
    # probs is exactly 0 there, so a single add assembles the slab.
    slab = probs + jnp.where(lane == action_dim, head, 0.0)
    out_ref[...] = slab.astype(out_ref.dtype)


def actor_critic_forward(x, params):
    """Run the ActorCritic forward pass via pallas_call.

    x: [B, state_dim] float32
    params: dict from init_params (pre-transposed [in, out] weights, fused/padded head).
    Returns (action_probs [B, action_dim], state_values [B, 1]).
    """
    B, state_dim = x.shape
    hidden_dim = params["w1"].shape[1]
    action_dim = params["action_dim"]
    head_pad = params["wh"].shape[1]

    # Advisory cost estimate: 3 matmuls + exp/reciprocal, all operands touched once.
    flops = 2 * B * (state_dim * hidden_dim + hidden_dim * hidden_dim
                     + hidden_dim * head_pad)
    bytes_accessed = 4 * (x.size + params["w1"].size + params["b1"].size
                          + params["w2"].size + params["b2"].size
                          + params["wh"].size + params["bh"].size
                          + B * head_pad)
    cost = pl.CostEstimate(flops=flops,
                           transcendentals=B * (head_pad + 1),
                           bytes_accessed=bytes_accessed)

    # All operands are small: full-array blocks resident in VMEM (no grid).
    vmem = pl.BlockSpec(memory_space=pltpu.MemorySpace.VMEM)

    slab = pl.pallas_call(
        functools.partial(actor_critic_kernel, action_dim=action_dim),
        out_shape=jax.ShapeDtypeStruct((B, head_pad), jnp.float32),
        in_specs=[vmem] * 7,
        out_specs=vmem,
        cost_estimate=cost,
    )(
        x,
        params["w1"], params["b1"],
        params["w2"], params["b2"],
        params["wh"], params["bh"],
    )

    action_probs = slab[:, :action_dim]
    state_values = slab[:, action_dim:action_dim + 1]
    return action_probs, state_values


def init_params(key, state_dim, action_dim, hidden_dim):
    """PyTorch-Linear-style init (uniform(-1/sqrt(fan_in), 1/sqrt(fan_in))).

    Weights are stored transposed as [in, out]; biases as [1, out].  The actor and
    critic heads are additionally fused+zero-padded ONCE into a lane-dense
    [hidden, round_up(action_dim+1, 128)] weight `wh` (and bias `bh`) for the kernel.
    """
    def linear(key, fan_in, fan_out):
        kw, kb = jax.random.split(key)
        bound = 1.0 / jnp.sqrt(fan_in)
        w = jax.random.uniform(kw, (fan_in, fan_out), jnp.float32, -bound, bound)
        b = jax.random.uniform(kb, (1, fan_out), jnp.float32, -bound, bound)
        return w, b

    k1, k2, k3, k4 = jax.random.split(key, 4)
    w1, b1 = linear(k1, state_dim, hidden_dim)
    w2, b2 = linear(k2, hidden_dim, hidden_dim)
    wa, ba = linear(k3, hidden_dim, action_dim)
    wc, bc = linear(k4, hidden_dim, 1)

    head_pad = _round_up(action_dim + 1, 128)
    wh = jnp.zeros((hidden_dim, head_pad), jnp.float32)
    wh = wh.at[:, :action_dim].set(wa)
    wh = wh.at[:, action_dim:action_dim + 1].set(wc)
    bh = jnp.zeros((1, head_pad), jnp.float32)
    bh = bh.at[:, :action_dim].set(ba)
    bh = bh.at[:, action_dim:action_dim + 1].set(bc)

    return dict(w1=w1, b1=b1, w2=w2, b2=b2,
                wa=wa, ba=ba, wc=wc, bc=bc,
                wh=wh, bh=bh, action_dim=action_dim)


def reference_forward(x, p):
    """Pure-JAX reference with identical semantics (unfused heads)."""
    h1 = jax.nn.relu(x @ p["w1"] + p["b1"])
    h2 = jax.nn.relu(h1 @ p["w2"] + p["b2"])
    probs = jax.nn.softmax(h2 @ p["wa"] + p["ba"], axis=-1)
    values = h2 @ p["wc"] + p["bc"]
    return probs, values


if __name__ == "__main__":
    B = 8            # batch (multiple of 8 sublanes)
    STATE_DIM = 16
    ACTION_DIM = 8
    HIDDEN_DIM = 128  # module default; keeps trunk matmuls 128-lane aligned

    key = jax.random.PRNGKey(0)
    kx, kp = jax.random.split(key)

    x = jax.random.normal(kx, (B, STATE_DIM), dtype=jnp.float32)
    params = init_params(kp, STATE_DIM, ACTION_DIM, HIDDEN_DIM)

    probs, values = actor_critic_forward(x, params)
    probs = jax.block_until_ready(probs)
    values = jax.block_until_ready(values)

    # sanity check against pure-JAX reference
    ref_probs, ref_values = reference_forward(x, params)
    assert probs.shape == (B, ACTION_DIM)
    assert values.shape == (B, 1)
    assert jnp.allclose(probs, ref_probs, atol=1e-5, rtol=1e-5)
    assert jnp.allclose(values, ref_values, atol=1e-5, rtol=1e-5)
    assert jnp.allclose(jnp.sum(probs, axis=-1), 1.0, atol=1e-5)

    print("KERNEL_OK")
</pallas_src>

<mosaic_0001>
module attributes {stable_mosaic.version = 11 : i64} {
  func.func @actor_critic_kernel(%arg0: memref<8x16xf32, #tpu.memory_space<vmem>>, %arg1: memref<16x128xf32, #tpu.memory_space<vmem>>, %arg2: memref<1x128xf32, #tpu.memory_space<vmem>>, %arg3: memref<128x128xf32, #tpu.memory_space<vmem>>, %arg4: memref<1x128xf32, #tpu.memory_space<vmem>>, %arg5: memref<128x128xf32, #tpu.memory_space<vmem>>, %arg6: memref<1x128xf32, #tpu.memory_space<vmem>>, %arg7: memref<8x128xf32, #tpu.memory_space<vmem>>) attributes {dimension_semantics = [], scalar_prefetch = 0 : i64, scratch_operands = 0 : i64, tpu.core_type = #tpu.core_type<tc>} {
    %c0 = arith.constant 0 : index
    %c0_0 = arith.constant 0 : index
    %0 = vector.load %arg0[%c0, %c0_0] : memref<8x16xf32, #tpu.memory_space<vmem>>, vector<8x16xf32>
    %c0_1 = arith.constant 0 : index
    %c0_2 = arith.constant 0 : index
    %1 = vector.load %arg1[%c0_1, %c0_2] : memref<16x128xf32, #tpu.memory_space<vmem>>, vector<16x128xf32>
    %cst = arith.constant dense<0.000000e+00> : vector<8x128xf32>
    %2 = tpu.matmul %0, %1, %cst {dimension_numbers = #tpu.dot_dimension_numbers<[1], [0], [0], [1], [0, 0, 1, 1], [], []>} : vector<8x16xf32>, vector<16x128xf32>, vector<8x128xf32> -> vector<8x128xf32>
    %c0_3 = arith.constant 0 : index
    %c0_4 = arith.constant 0 : index
    %3 = vector.load %arg2[%c0_3, %c0_4] : memref<1x128xf32, #tpu.memory_space<vmem>>, vector<1x128xf32>
    %4 = vector.broadcast %3 : vector<1x128xf32> to vector<8x128xf32>
    %5 = arith.addf %2, %4 : vector<8x128xf32>
    %cst_5 = arith.constant 0.000000e+00 : f32
    %6 = vector.broadcast %cst_5 : f32 to vector<8x128xf32>
    %7 = arith.maximumf %5, %6 : vector<8x128xf32>
    %c0_6 = arith.constant 0 : index
    %c0_7 = arith.constant 0 : index
    %8 = vector.load %arg3[%c0_6, %c0_7] : memref<128x128xf32, #tpu.memory_space<vmem>>, vector<128x128xf32>
    %cst_8 = arith.constant dense<0.000000e+00> : vector<8x128xf32>
    %9 = tpu.matmul %7, %8, %cst_8 {dimension_numbers = #tpu.dot_dimension_numbers<[1], [0], [0], [1], [0, 0, 1, 1], [], []>} : vector<8x128xf32>, vector<128x128xf32>, vector<8x128xf32> -> vector<8x128xf32>
    %c0_9 = arith.constant 0 : index
    %c0_10 = arith.constant 0 : index
    %10 = vector.load %arg4[%c0_9, %c0_10] : memref<1x128xf32, #tpu.memory_space<vmem>>, vector<1x128xf32>
    %11 = vector.broadcast %10 : vector<1x128xf32> to vector<8x128xf32>
    %12 = arith.addf %9, %11 : vector<8x128xf32>
    %cst_11 = arith.constant 0.000000e+00 : f32
    %13 = vector.broadcast %cst_11 : f32 to vector<8x128xf32>
    %14 = arith.maximumf %12, %13 : vector<8x128xf32>
    %c0_12 = arith.constant 0 : index
    %c0_13 = arith.constant 0 : index
    %15 = vector.load %arg5[%c0_12, %c0_13] : memref<128x128xf32, #tpu.memory_space<vmem>>, vector<128x128xf32>
    %cst_14 = arith.constant dense<0.000000e+00> : vector<8x128xf32>
    %16 = tpu.matmul %14, %15, %cst_14 {dimension_numbers = #tpu.dot_dimension_numbers<[1], [0], [0], [1], [0, 0, 1, 1], [], []>} : vector<8x128xf32>, vector<128x128xf32>, vector<8x128xf32> -> vector<8x128xf32>
    %c0_15 = arith.constant 0 : index
    %c0_16 = arith.constant 0 : index
    %17 = vector.load %arg6[%c0_15, %c0_16] : memref<1x128xf32, #tpu.memory_space<vmem>>, vector<1x128xf32>
    %18 = vector.broadcast %17 : vector<1x128xf32> to vector<8x128xf32>
    %19 = arith.addf %16, %18 : vector<8x128xf32>
    %20 = tpu.iota {dimensions = array<i32: 1>} : vector<8x128xi32>
    %c8_i32 = arith.constant 8 : i32
    %21 = vector.broadcast %c8_i32 : i32 to vector<8x128xi32>
    %22 = arith.cmpi slt, %20, %21 : vector<8x128xi32>
    %cst_17 = arith.constant 0xFF800000 : f32
    %23 = vector.broadcast %cst_17 : f32 to vector<8x128xf32>
    %24 = arith.select %22, %19, %23 : vector<8x128xi1>, vector<8x128xf32>
    %cst_18 = arith.constant dense<0xFF800000> : vector<8xf32>
    %25 = vector.multi_reduction <maximumf>, %24, %cst_18 [1] : vector<8x128xf32> to vector<8xf32>
    %26 = vector.shape_cast %25 : vector<8xf32> to vector<8x1xf32>
    %27 = vector.broadcast %26 : vector<8x1xf32> to vector<8x128xf32>
    %28 = arith.subf %24, %27 : vector<8x128xf32>
    %29 = math.exp %28 : vector<8x128xf32>
    %cst_19 = arith.constant dense<0.000000e+00> : vector<8xf32>
    %30 = vector.multi_reduction <add>, %29, %cst_19 [1] : vector<8x128xf32> to vector<8xf32>
    %31 = vector.shape_cast %30 : vector<8xf32> to vector<8x1xf32>
    %32 = tpu.reciprocal %31 : vector<8x1xf32> -> vector<8x1xf32>
    %33 = vector.broadcast %32 : vector<8x1xf32> to vector<8x128xf32>
    %34 = arith.mulf %29, %33 : vector<8x128xf32>
    %c8_i32_20 = arith.constant 8 : i32
    %35 = vector.broadcast %c8_i32_20 : i32 to vector<8x128xi32>
    %36 = arith.cmpi eq, %20, %35 : vector<8x128xi32>
    %cst_21 = arith.constant 0.000000e+00 : f32
    %37 = vector.broadcast %cst_21 : f32 to vector<8x128xf32>
    %38 = arith.select %36, %19, %37 : vector<8x128xi1>, vector<8x128xf32>
    %39 = arith.addf %34, %38 : vector<8x128xf32>
    %c0_22 = arith.constant 0 : index
    %c0_23 = arith.constant 0 : index
    %40 = vector.load %arg7[%c0_22, %c0_23] : memref<8x128xf32, #tpu.memory_space<vmem>>, vector<8x128xf32>
    tpu.vector_store %arg7[%c0_22, %c0_23], %39 {strides = array<i32>} : memref<8x128xf32, #tpu.memory_space<vmem>>, vector<8x128xf32>,
    return
  }
}

</mosaic_0001>

<bundles_post_ra>
// kernel: tpu_custom_call.1
= control target key start
LH: loop header
LB: loop body
LE: loop exit
PB: predicated region body
PF: predicated region fallthrough
CT: control target
= control target key end

     0   :  { %12 = vsyncpa [#allocation3], 0  ;;  %s464_s0 = inlined_call_operand.hbm [shape: f32[8,16], index: 0, kind: input, shape index: {}]   ;;  %s465_s1 = inlined_call_operand.hbm [shape: f32[16,128], index: 1, kind: input, shape index: {}]   ;;  %s466_s2 = inlined_call_operand.vmem [shape: f32[1,128], index: 2, kind: input, shape index: {}]   ;;  %s467_s3 = inlined_call_operand.hbm [shape: f32[128,128], index: 3, kind: input, shape index: {}]   ;;  %s468_s4 = inlined_call_operand.vmem [shape: f32[1,128], index: 4, kind: input, shape index: {}]   ;;  %s469_s5 = inlined_call_operand.hbm [shape: f32[128,128], index: 5, kind: input, shape index: {}]   ;;  %s470_s6 = inlined_call_operand.vmem [shape: f32[1,128], index: 6, kind: input, shape index: {}]   ;;  %s471_s7 = inlined_call_operand.hbm [shape: f32[8,128], index: 7, kind: output, shape index: {}]  }
   0x1   :  { %13 = vsyncpa [#allocation6], 0 }
   0x2   :  { %14 = vsyncpa [#allocation9], 0  ;;  %s31_s26 = sshll.u32 %s465_s1, 4  ;;  %s32_s26 = int_to_ptr.hbm [resolvable:$true] %s31_s26 }
   0x3   :  { %15 = vsyncpa [#allocation4], 0  ;;  %s393_s27 = smov [#allocation5]   ;;  %s21_s8 = sshll.u32 %s464_s0, 4  ;;  %s22_s8 = int_to_ptr.hbm [resolvable:$true] %s21_s8 }
   0x4   :  { %s33_s28 = sshll.u32 %s393_s27, 4  ;;  %s394_s9 = smov 128   ;;  %s34_s28 = int_to_ptr.vmem [resolvable:$true] %s33_s28 }
   0x5   :  { %s395_s10 = smov 8   ;;  %s396_s11 = smov [#allocation2]  }
   0x6   :  { %39 = dma.hbm_to_vmem [thread:$0]  %s32_s26, 256, %s34_s28, [#allocation6], %s394_s9, %s394_s9, %s395_s10  }
   0x7   :  { %s23_s12 = sshll.u32 %s396_s11, 4  ;;  %s46_s15 = sshll.u32 %s467_s3, 4  ;;  %s24_s12 = int_to_ptr.vmem [resolvable:$true] %s23_s12  ;;  %s47_s15 = int_to_ptr.hbm [resolvable:$true] %s46_s15 }
   0x8   :  { %26 = dma.hbm_to_vmem [thread:$0]  %s22_s8, 128, %s24_s12, [#allocation3]  }
   0x9   :  { %s61_s17 = sshll.u32 %s469_s5, 4  ;;  %s397_s18 = smov [#allocation7]   ;;  %s62_s17 = int_to_ptr.hbm [resolvable:$true] %s61_s17 }
   0xa   :  { %s48_s19 = sshll.u32 %s397_s18, 4  ;;  %s398_s0 = smov [#allocation8]   ;;  %s49_s19 = int_to_ptr.vmem [resolvable:$true] %s48_s19 }
   0xb   :  { %54 = dma.hbm_to_vmem [thread:$0]  %s47_s15, 2048, %s49_s19, [#allocation6], %s394_s9, %s394_s9, %s395_s10  }
   0xc   :  { %s63_s20 = sshll.u32 %s398_s0, 4  ;;  %s64_s20 = int_to_ptr.vmem [resolvable:$true] %s63_s20 }
   0xd   :  { %69 = dma.hbm_to_vmem [thread:$0]  %s62_s17, 2048, %s64_s20, [#allocation9], %s394_s9, %s394_s9, %s395_s10  }
   0xe   :  { %385 = dma.done.wait [#allocation3], 128  }
   0xf   :  { %386 = vsyncadd [#allocation3], 4294967168 }
  0x10   :  { %387 = dma.done.wait [#allocation6], 2304  }
  0x11   :  { %388 = vsyncadd [#allocation6], 4294964992 }
  0x12   :  { %389 = dma.done.wait [#allocation9], 2048  }
  0x13   :  { %390 = vsyncadd [#allocation9], 4294965248  ;;  %v90_v0 = vld [vmem:[#allocation5 + $0x8] sm:$0xff]  ;;  %v89_v1 = vld [vmem:[#allocation5] sm:$0xff]  ;;  %vm95_vm0 = vcmask 130048   ;;  %v201_v43 = vlaneseq  ;;  %s238_s26 = sshll.u32 %s471_s7, 4  ;;  %s239_s26 = int_to_ptr.hbm [resolvable:$true] %s238_s26 }
  0x14   :  { %113 = vmatpush.msra.mxu0 %v90_v0  ;;  %v88_v2 = vld [vmem:[#allocation2] sm:$0xff]  ;;  %v135_v3 = vld [vmem:[#allocation7 + $0x78] sm:$0xff]  ;;  %v134_v4 = vld [vmem:[#allocation7 + $0x70] sm:$0xff] }
  0x15   :  { %140 = vmatpush.msra.mxu1 %v135_v3  ;;  %v133_v5 = vld [vmem:[#allocation7 + $0x68] sm:$0xff]  ;;  %v132_v6 = vld [vmem:[#allocation7 + $0x60] sm:$0xff]  ;;  %v131_v7 = vld [vmem:[#allocation7 + $0x58] sm:$0xff]  ;;  %v202_v44 = vand.u32 127, %v201_v43 }
  0x16   :  { %114 = vmatpush.msra.mxu0 %v89_v1  ;;  %v130_v8 = vld [vmem:[#allocation7 + $0x50] sm:$0xff]  ;;  %v129_v9 = vld [vmem:[#allocation7 + $0x48] sm:$0xff]  ;;  %v128_v10 = vld [vmem:[#allocation7 + $0x40] sm:$0xff] }
  0x17   :  { %250 = vmatmul.msk.f32.vlgmr.msra.gmra.mxu0 %vm95_vm0, %v88_v2  ;;  %141 = vmatpush.msra.mxu1 %v134_v4  ;;  %v127_v11 = vld [vmem:[#allocation7 + $0x38] sm:$0xff]  ;;  %v126_v12 = vld [vmem:[#allocation7 + $0x30] sm:$0xff]  ;;  %v125_v13 = vld [vmem:[#allocation7 + $0x28] sm:$0xff]  ;;  %vm227_vm1 = vcmp.eq.s32.totalorder %v202_v44, 8  ;;  %vm203_vm2 = vcmp.lt.s32.totalorder %v202_v44, 8 }
  0x18   :  { %v124_v14 = vld [vmem:[#allocation7 + $0x20] sm:$0xff]  ;;  %v123_v15 = vld [vmem:[#allocation7 + $0x18] sm:$0xff]  ;;  %v122_v16 = vld [vmem:[#allocation7 + $0x10] sm:$0xff] }
  0x19   :  { %142 = vmatpush.msra.mxu1 %v133_v5  ;;  %v121_v17 = vld [vmem:[#allocation7 + $0x8] sm:$0xff]  ;;  %v120_v18 = vld [vmem:[#allocation7] sm:$0xff]  ;;  %v176_v19 = vld [vmem:[#allocation8 + $0x78] sm:$0xff] }
  0x1a   :  { %v175_v20 = vld [vmem:[#allocation8 + $0x70] sm:$0xff]  ;;  %181 = vmatpush.msra.mxu2 %v176_v19  ;;  %v174_v21 = vld [vmem:[#allocation8 + $0x68] sm:$0xff]  ;;  %v173_v22 = vld [vmem:[#allocation8 + $0x60] sm:$0xff] }
  0x1b   :  { %143 = vmatpush.msra.mxu1 %v132_v6  ;;  %v172_v23 = vld [vmem:[#allocation8 + $0x58] sm:$0xff]  ;;  %v171_v24 = vld [vmem:[#allocation8 + $0x50] sm:$0xff]  ;;  %v170_v25 = vld [vmem:[#allocation8 + $0x48] sm:$0xff] }
  0x1c   :  { %182 = vmatpush.msra.mxu2 %v175_v20  ;;  %v169_v26 = vld [vmem:[#allocation8 + $0x40] sm:$0xff]  ;;  %v168_v27 = vld [vmem:[#allocation8 + $0x38] sm:$0xff]  ;;  %v167_v28 = vld [vmem:[#allocation8 + $0x30] sm:$0xff] }
  0x1d   :  { %144 = vmatpush.msra.mxu1 %v131_v7  ;;  %v166_v29 = vld [vmem:[#allocation8 + $0x28] sm:$0xff]  ;;  %v165_v30 = vld [vmem:[#allocation8 + $0x20] sm:$0xff]  ;;  %v164_v31 = vld [vmem:[#allocation8 + $0x18] sm:$0xff] }
  0x1e   :  { %183 = vmatpush.msra.mxu2 %v174_v21  ;;  %v258_v32 = vld [vmem:[%s466_s2] ss:$0 sm:$0xff]  ;;  %v163_v36 = vld [vmem:[#allocation8 + $0x10] sm:$0xff]  ;;  %v161_v38 = vld [vmem:[#allocation8] sm:$0xff] }
  0x1f   :  { %145 = vmatpush.msra.mxu1 %v130_v8  ;;  %v162_v37 = vld [vmem:[#allocation8 + $0x8] sm:$0xff] }
  0x20   :  { %184 = vmatpush.msra.mxu2 %v173_v22  ;;  %v259_v39 = vld [vmem:[%s468_s4] ss:$0 sm:$0xff]  ;;  %s399_s4 = smov [#allocation10]  }
  0x21   :  { %146 = vmatpush.msra.mxu1 %v129_v9  ;;  %v260_v45 = vld [vmem:[%s470_s6] ss:$0 sm:$0xff]  ;;  %s236_s6 = sshll.u32 %s399_s4, 4  ;;  %s237_s6 = int_to_ptr.vmem [resolvable:$true] %s236_s6 }
  0x22   :  { %185 = vmatpush.msra.mxu2 %v172_v23 }
  0x23   :  { %147 = vmatpush.msra.mxu1 %v128_v10 }
  0x24   :  { %186 = vmatpush.msra.mxu2 %v171_v24 }
  0x25   :  { %148 = vmatpush.msra.mxu1 %v127_v11 }
  0x26   :  { %187 = vmatpush.msra.mxu2 %v170_v25 }
  0x27   :  { %149 = vmatpush.msra.mxu1 %v126_v12 }
  0x28   :  { %188 = vmatpush.msra.mxu2 %v169_v26 }
  0x29   :  { %150 = vmatpush.msra.mxu1 %v125_v13 }
  0x2a   :  { %189 = vmatpush.msra.mxu2 %v168_v27 }
  0x2b   :  { %151 = vmatpush.msra.mxu1 %v124_v14 }
  0x2c   :  { %190 = vmatpush.msra.mxu2 %v167_v28 }
  0x2d   :  { %152 = vmatpush.msra.mxu1 %v123_v15 }
  0x2e   :  { %191 = vmatpush.msra.mxu2 %v166_v29 }
  0x2f   :  { %153 = vmatpush.msra.mxu1 %v122_v16 }
  0x30   :  { %192 = vmatpush.msra.mxu2 %v165_v30 }
  0x31   :  { %154 = vmatpush.msra.mxu1 %v121_v17 }
  0x32   :  { %193 = vmatpush.msra.mxu2 %v164_v31 }
  0x33   :  { %155 = vmatpush.msra.mxu1 %v120_v18 }
  0x34   :  { %194 = vmatpush.msra.mxu2 %v163_v36 }
  0x36   :  { %195 = vmatpush.msra.mxu2 %v162_v37 }
  0x38   :  { %196 = vmatpush.msra.mxu2 %v161_v38 }
  0x94   :  { %v116_v33 = vpop.f32.mrf.mxu0 }
  0x95   :  { %v117_v34 = vadd.f32 %v258_v32, %v116_v33 }
  0x97   :  { %v119_v35 = vmax.f32 %v117_v34, 0.0 }
  0x99   :  { %156 = vmatmul.f32.vlgmr.msra.gmra.mxu1 %v119_v35 }
 0x116   :  { %v157_v40 = vpop.f32.mrf.mxu1 }
 0x117   :  { %v158_v41 = vadd.f32 %v259_v39, %v157_v40 }
 0x119   :  { %v160_v42 = vmax.f32 %v158_v41, 0.0 }
 0x11b   :  { %197 = vmatmul.f32.vlgmr.msra.gmra.mxu2 %v160_v42 }
 0x19e   :  { %v198_v46 = vpop.f32.mrf.mxu2 }
 0x19f   :  { %v199_v47 = vadd.f32 %v260_v45, %v198_v46 }
 0x1a1   :  { %v228_v48 = vsel %vm227_vm1, %v199_v47, 0.0  ;;  %v204_v49 = vsel %vm203_vm2, %v199_v47, -inf }
 0x1a2   :  { %205 = vmax.xlane.f32.xlu0 %v204_v49 }
 0x215   :  { %v206_v50 = vpop.xlane.xlu0 %205 }
 0x216   :  { %v207_v51 = vsub.f32 %v204_v49, %v206_v50 }
 0x218   :  { %v208_v52 = vmul.f32 1.442695, %v207_v51 }
 0x21a   :  { %261 = vpow2.f32 %v208_v52 }
 0x220   :  { %v262_v53 = vpop.eup %261 }
 0x221   :  { %210 = vadd.xlane.f32.xlu0 %v262_v53 }
 0x294   :  { %v211_v54 = vpop.xlane.xlu0 %210 }
 0x295   :  { %263 = vrcp.f32 %v211_v54  ;;  %v223_v58 = vand.u32 2147483648, %v211_v54  ;;  %v221_v60 = vand.u32 2147483647, %v211_v54  ;;  %vm217_vm4 = vweird.f32 %v211_v54 }
 0x297   :  { %v224_v62 = vor.u32 1.1754944e-38, %v223_v58  ;;  %vm222_vm6 = vcmp.eq.f32.partialorder %v221_v60, 8.507059e+37 }
 0x29b   :  { %v264_v55 = vpop.eup %263 }
 0x29c   :  { %v213_v56 = vmul.f32 %v264_v55, %v211_v54  ;;  %vm218_vm3 = vweird.f32 %v264_v55 }
 0x29d   :  { %vm219_vm5 = vmor %vm217_vm4, %vm218_vm3 }
 0x29e   :  { %v214_v57 = vsub.f32 1.0, %v213_v56 }
 0x2a0   :  { %v215_v59 = vmul.f32 %v264_v55, %v214_v57 }
 0x2a2   :  { %v216_v61 = vadd.f32 %v264_v55, %v215_v59 }
 0x2a4   :  { %v220_v63 = vsel %vm219_vm5, %v264_v55, %v216_v61 }
 0x2a5   :  { %v225_v0 = vsel %vm222_vm6, %v224_v62, %v220_v63 }
 0x2a6   :  { %v226_v1 = vmul.f32 %v262_v53, %v225_v0 }
 0x2a8   :  { %v229_v2 = vadd.f32 %v228_v48, %v226_v1 }
 0x2aa   :  { %230 = vst [vmem:[#allocation10] sm:$0xff] %v229_v2 }
 0x2ab   :  { %241 = dma.vmem_to_hbm [thread:$0]  %s237_s6, 128, %s239_s26, [#allocation4]  }
 0x2ac   :  { %391 = dma.done.wait [#allocation4], 128  }
 0x2ad   :  { %392 = vsyncadd [#allocation4], 4294967168 }
 0x2ae   :  { %246 = vsyncpa [#allocation3], 1 }
 0x2af   :  { %247 = vsyncpa [#allocation6], 1 }
 0x2b0   :  { %248 = vsyncpa [#allocation9], 1 }
 0x2b1   :  { %249 = vsyncpa [#allocation4], 1 }

</bundles_post_ra>
